<compile_context>
chip_gen: v7x
topology: tpu7x:2x2x1
jax: 0.10.0
libtpu: 0.0.40
codegen_flags: <defaults>
</compile_context>

<pallas_src>
import functools
import math

import jax
import jax.numpy as jnp
from jax import lax
from jax.experimental import pallas as pl
from jax.experimental.pallas import tpu as pltpu


def _mha_head_kernel(x_ref, wqkv_ref, bqkv_ref, wp_ref, bp_ref, o_ref, acc_ref, *,
                     d_h, kv_chunk, mxu_dtype, approx_recip):
    # x_ref:    (1, N, D)            wqkv_ref: (1, D, 3*d_h)   bqkv_ref: (1, 1, 3*d_h)
    # wp_ref:   (1, d_h, D)          bp_ref:   (1, D)
    # o_ref:    (1, N, D)            acc_ref:  (N, D) f32 scratch (persists over h)
    h = pl.program_id(1)
    num_heads = pl.num_programs(1)

    @pl.when(h == 0)
    def _():
        acc_ref[...] = jnp.zeros_like(acc_ref)

    x = x_ref[0].astype(mxu_dtype)                                    # (N, D)
    N = x.shape[0]

    # Fused per-head QKV projection on the MXU (bf16 operands, f32 accumulation).
    # 1/sqrt(d_h) is already folded into Wq / bq at trace time.
    qkv = jnp.dot(x, wqkv_ref[0],
                  preferred_element_type=jnp.float32) + bqkv_ref[0]   # (N, 3*d_h) f32
    q = qkv[:, 0 * d_h:1 * d_h]
    k = qkv[:, 1 * d_h:2 * d_h]
    v = qkv[:, 2 * d_h:3 * d_h]

    qm = q.astype(mxu_dtype)
    km = k.astype(mxu_dtype)
    vm = v.astype(mxu_dtype)

    # Flash-style online softmax over KV chunks: only an (N, kv_chunk) score tile
    # is live per step instead of the full (N, N) tile (decisive on v7x's 64 MiB
    # VMEM at realistic N).  Chunk boundaries are static -> static slices only.
    kv_c = kv_chunk if (kv_chunk is not None and N % kv_chunk == 0) else N
    n_chunks = N // kv_c

    m_i = jnp.full((N, 1), -jnp.inf, dtype=jnp.float32)
    l_i = jnp.zeros((N, 1), dtype=jnp.float32)
    acc = jnp.zeros((N, d_h), dtype=jnp.float32)
    for c in range(n_chunks):                                         # static trip count
        kc = km[c * kv_c:(c + 1) * kv_c, :]                           # (kv_c, d_h)
        vc = vm[c * kv_c:(c + 1) * kv_c, :]
        # S = Q Kc^T without materializing a transpose (contract d_h on both sides).
        s = lax.dot_general(qm, kc,
                            dimension_numbers=(((1,), (1,)), ((), ())),
                            preferred_element_type=jnp.float32)       # (N, kv_c) f32
        m_new = jnp.maximum(m_i, jnp.max(s, axis=-1, keepdims=True))
        alpha = jnp.exp(m_i - m_new)                                  # rescale old stats
        p = jnp.exp(s - m_new)
        l_i = alpha * l_i + jnp.sum(p, axis=-1, keepdims=True)
        acc = alpha * acc + jnp.dot(p.astype(mxu_dtype), vc,
                                    preferred_element_type=jnp.float32)
        m_i = m_new

    # Deferred softmax normalization on the (N, d_h) output (EUP reciprocal slot).
    oh = acc * pl.reciprocal(l_i, approx=approx_recip)                # (N, d_h) f32

    # Output projection distributed over heads: acc += Oh @ Wp[h*d_h:(h+1)*d_h, :]
    # (the head concat disappears entirely).
    acc_ref[...] += jnp.dot(oh.astype(mxu_dtype), wp_ref[0],
                            preferred_element_type=jnp.float32)       # (N, D)

    @pl.when(h == num_heads - 1)
    def _():
        o_ref[0] = (acc_ref[...] + bp_ref[...]).astype(o_ref.dtype)


def _pick_vmem_limit_bytes():
    """Generation-aware scoped-VMEM limit (replaces the hardcoded 32 MiB)."""
    try:
        cap = pltpu.get_tpu_info().vmem_capacity_bytes
    except Exception:  # older/newer jax builds or attribute rename
        cap = None
    if cap is None:
        cap = 64 * 1024 * 1024
    if cap >= 128 * 1024 * 1024:
        return 100 * 1024 * 1024          # v5e / v6e: use the 128 MiB generously
    return 48 * 1024 * 1024               # v7x-class (64 MiB): leave pipelining headroom


def multi_head_attention(x, params, num_heads, *, mxu_dtype=jnp.bfloat16,
                         kv_chunk=512):
    """Pallas implementation of MultiHeadAttention.forward (single fused kernel)."""
    B, N, D = x.shape
    d_h = D // num_heads
    wq, bq, wk, bk, wv, bv, wp, bp = params

    # Fold 1/sqrt(d_h) into Wq/bq at trace time (zero in-kernel cost); pack Q/K/V
    # into one (H, D, 3*d_h) operand so the per-head QKV projection is one matmul.
    # Weights are pre-cast to the MXU dtype (halves weight DMA + VMEM); biases stay
    # f32 (added to the f32 accumulator).
    scale = 1.0 / math.sqrt(d_h)
    wqkv = jnp.concatenate([wq * scale, wk, wv], axis=-1).astype(mxu_dtype)  # (H, D, 3*d_h)
    bqkv = jnp.concatenate([bq * scale, bk, bv], axis=-1)                    # (H, 1, 3*d_h) f32
    # Output projection rows split per head (row block h multiplies head h's output).
    wp_h = wp.reshape(num_heads, d_h, D).astype(mxu_dtype)                   # (H, d_h, D)

    kernel = functools.partial(_mha_head_kernel, d_h=d_h, kv_chunk=kv_chunk,
                               mxu_dtype=mxu_dtype,
                               approx_recip=(mxu_dtype == jnp.bfloat16))

    return pl.pallas_call(
        kernel,
        out_shape=jax.ShapeDtypeStruct((B, N, D), x.dtype),
        grid_spec=pltpu.PrefetchScalarGridSpec(
            num_scalar_prefetch=0,
            grid=(B, num_heads),
            in_specs=[
                # X block is constant over h -> fetched once per batch element.
                pl.BlockSpec((1, N, D), lambda b, h: (b, 0, 0)),               # X
                pl.BlockSpec((1, D, 3 * d_h), lambda b, h: (h, 0, 0)),         # Wqkv[h]
                pl.BlockSpec((1, 1, 3 * d_h), lambda b, h: (h, 0, 0)),         # bqkv[h]
                pl.BlockSpec((1, d_h, D), lambda b, h: (h, 0, 0)),             # Wp rows of head h
                pl.BlockSpec((1, D), lambda b, h: (0, 0)),                     # bp
            ],
            # Output block constant over h -> resident accumulator across heads.
            out_specs=pl.BlockSpec((1, N, D), lambda b, h: (b, 0, 0)),
            scratch_shapes=[pltpu.VMEM((N, D), jnp.float32)],                  # out-proj accumulator
        ),
        compiler_params=pltpu.CompilerParams(
            dimension_semantics=("parallel", "arbitrary"),
            vmem_limit_bytes=_pick_vmem_limit_bytes()),
    )(x, wqkv, bqkv, wp_h, bp)


def init_params(key, num_heads, D):
    """Deterministic init mimicking nn.Linear's U(-1/sqrt(fan_in), 1/sqrt(fan_in)).

    Weights are stored transposed relative to PyTorch: (in_features, out_features),
    so y = x @ W + b.
    """
    d_h = D // num_heads
    ks = jax.random.split(key, 8)
    bound = 1.0 / math.sqrt(D)
    u = lambda k, shape: jax.random.uniform(k, shape, jnp.float32, -bound, bound)
    wq = u(ks[0], (num_heads, D, d_h))
    bq = u(ks[1], (num_heads, 1, d_h))
    wk = u(ks[2], (num_heads, D, d_h))
    bk = u(ks[3], (num_heads, 1, d_h))
    wv = u(ks[4], (num_heads, D, d_h))
    bv = u(ks[5], (num_heads, 1, d_h))
    wp = u(ks[6], (D, D))
    bp = u(ks[7], (1, D))
    return (wq, bq, wk, bk, wv, bv, wp, bp)


def reference_mha(x, params, num_heads):
    """Pure-JAX reference matching the PyTorch forward exactly."""
    B, N, D = x.shape
    d_h = D // num_heads
    wq, bq, wk, bk, wv, bv, wp, bp = params
    outs = []
    for h in range(num_heads):
        q = x @ wq[h] + bq[h]
        k = x @ wk[h] + bk[h]
        v = x @ wv[h] + bv[h]
        s = jnp.einsum("bnd,bmd->bnm", q, k) / math.sqrt(d_h)
        a = jax.nn.softmax(s, axis=-1)
        outs.append(jnp.einsum("bnm,bmd->bnd", a, v))
    cat = jnp.concatenate(outs, axis=-1).reshape(B, -1, D)
    return cat @ wp + bp


if __name__ == "__main__":
    B, N, D = 2, 8, 32
    num_heads = 4

    key = jax.random.PRNGKey(0)
    k_x, k_p = jax.random.split(key)
    x = jax.random.normal(k_x, (B, N, D), dtype=jnp.float32)
    params = init_params(k_p, num_heads, D)

    ref = reference_mha(x, params, num_heads)

    # f32-MXU path: tight tolerance against the f32 reference (single KV chunk).
    out_f32 = jax.block_until_ready(
        multi_head_attention(x, params, num_heads, mxu_dtype=jnp.float32))
    assert out_f32.shape == (B, N, D)
    assert jnp.allclose(out_f32, ref, atol=1e-4, rtol=1e-4), "f32 mismatch vs reference"

    # Exercise the multi-chunk online-softmax path (2 KV chunks at N=8).
    out_chunked = jax.block_until_ready(
        multi_head_attention(x, params, num_heads, mxu_dtype=jnp.float32, kv_chunk=4))
    assert jnp.allclose(out_chunked, ref, atol=1e-4, rtol=1e-4), "chunked mismatch vs reference"

    # Default bf16-MXU path (fast on v5e/v6e/v7x): bf16 operands, f32 accumulation.
    out_bf16 = jax.block_until_ready(multi_head_attention(x, params, num_heads))
    assert out_bf16.shape == (B, N, D)
    assert jnp.allclose(out_bf16, ref, atol=2e-2, rtol=2e-2), "bf16 mismatch vs reference"

    print("KERNEL_OK")
</pallas_src>

<mosaic_0001>
module attributes {stable_mosaic.version = 11 : i64} {
  func.func @_mha_head_kernel(%arg0: i32, %arg1: i32, %arg2: memref<1x8x32xf32, #tpu.memory_space<vmem>>, %arg3: memref<1x32x24xf32, #tpu.memory_space<vmem>>, %arg4: memref<1x1x24xf32, #tpu.memory_space<vmem>>, %arg5: memref<1x8x32xf32, #tpu.memory_space<vmem>>, %arg6: memref<1x32xf32, #tpu.memory_space<vmem>>, %arg7: memref<1x8x32xf32, #tpu.memory_space<vmem>>, %arg8: memref<8x32xf32, #tpu.memory_space<vmem>>) attributes {dimension_semantics = [#tpu.dimension_semantics<parallel>, #tpu.dimension_semantics<arbitrary>], iteration_bounds = array<i64: 2, 4>, scalar_prefetch = 0 : i64, scratch_operands = 1 : i64, tpu.core_type = #tpu.core_type<tc>, window_params = [{transform_indices = @transform_0, window_bounds = array<i64: 1, 8, 32>}, {transform_indices = @transform_1, window_bounds = array<i64: 1, 32, 24>}, {transform_indices = @transform_2, window_bounds = array<i64: 1, 1, 24>}, {transform_indices = @transform_3, window_bounds = array<i64: 1, 8, 32>}, {pipeline_mode = #tpu.pipeline_mode<synchronous>, transform_indices = @transform_4, window_bounds = array<i64: 1, 32>}, {transform_indices = @transform_5, window_bounds = array<i64: 1, 8, 32>}]} {
    %c0_i32 = arith.constant 0 : i32
    %0 = arith.cmpi eq, %arg1, %c0_i32 : i32
    %1 = arith.extui %0 : i1 to i32
    %c0_i32_0 = arith.constant 0 : i32
    %2 = arith.cmpi ne, %1, %c0_i32_0 : i32
    scf.if %2 {
      %cst_25 = arith.constant 0.000000e+00 : f32
      %47 = vector.broadcast %cst_25 : f32 to vector<8x32xf32>
      %c0_26 = arith.constant 0 : index
      %c0_27 = arith.constant 0 : index
      %48 = vector.load %arg8[%c0_26, %c0_27] : memref<8x32xf32, #tpu.memory_space<vmem>>, vector<8x32xf32>
      tpu.vector_store %arg8[%c0_26, %c0_27], %47 {strides = array<i32>} : memref<8x32xf32, #tpu.memory_space<vmem>>, vector<8x32xf32>,
    } else {
    }
    %c0 = arith.constant 0 : index
    %c0_1 = arith.constant 0 : index
    %c0_2 = arith.constant 0 : index
    %3 = vector.load %arg2[%c0, %c0_1, %c0_2] : memref<1x8x32xf32, #tpu.memory_space<vmem>>, vector<1x8x32xf32>
    %4 = vector.shape_cast %3 : vector<1x8x32xf32> to vector<8x32xf32>
    %c0_3 = arith.constant 0 : index
    %c0_4 = arith.constant 0 : index
    %c0_5 = arith.constant 0 : index
    %5 = vector.load %arg3[%c0_3, %c0_4, %c0_5] : memref<1x32x24xf32, #tpu.memory_space<vmem>>, vector<1x32x24xf32>
    %6 = vector.shape_cast %5 : vector<1x32x24xf32> to vector<32x24xf32>
    %cst = arith.constant dense<0.000000e+00> : vector<8x24xf32>
    %7 = tpu.matmul %4, %6, %cst {dimension_numbers = #tpu.dot_dimension_numbers<[1], [0], [0], [1], [0, 0, 1, 1], [], []>} : vector<8x32xf32>, vector<32x24xf32>, vector<8x24xf32> -> vector<8x24xf32>
    %c0_6 = arith.constant 0 : index
    %c0_7 = arith.constant 0 : index
    %c0_8 = arith.constant 0 : index
    %8 = vector.load %arg4[%c0_6, %c0_7, %c0_8] : memref<1x1x24xf32, #tpu.memory_space<vmem>>, vector<1x1x24xf32>
    %9 = vector.shape_cast %8 : vector<1x1x24xf32> to vector<1x24xf32>
    %10 = vector.broadcast %9 : vector<1x24xf32> to vector<8x24xf32>
    %11 = arith.addf %7, %10 : vector<8x24xf32>
    %12 = vector.extract_strided_slice %11 {offsets = [0, 0], sizes = [8, 8], strides = [1, 1]} : vector<8x24xf32> to vector<8x8xf32>
    %13 = vector.extract_strided_slice %11 {offsets = [0, 8], sizes = [8, 8], strides = [1, 1]} : vector<8x24xf32> to vector<8x8xf32>
    %14 = vector.extract_strided_slice %11 {offsets = [0, 16], sizes = [8, 8], strides = [1, 1]} : vector<8x24xf32> to vector<8x8xf32>
    %cst_9 = arith.constant 0xFF800000 : f32
    %15 = vector.broadcast %cst_9 : f32 to vector<8x1xf32>
    %cst_10 = arith.constant 0.000000e+00 : f32
    %16 = vector.broadcast %cst_10 : f32 to vector<8x1xf32>
    %cst_11 = arith.constant 0.000000e+00 : f32
    %17 = vector.broadcast %cst_11 : f32 to vector<8x8xf32>
    %cst_12 = arith.constant dense<0.000000e+00> : vector<8x8xf32>
    %18 = tpu.matmul %12, %13, %cst_12 {dimension_numbers = #tpu.dot_dimension_numbers<[1], [1], [0], [0], [0, 0, 1, 0], [], []>} : vector<8x8xf32>, vector<8x8xf32>, vector<8x8xf32> -> vector<8x8xf32>
    %cst_13 = arith.constant dense<0xFF800000> : vector<8xf32>
    %19 = vector.multi_reduction <maximumf>, %18, %cst_13 [1] : vector<8x8xf32> to vector<8xf32>
    %20 = vector.shape_cast %19 : vector<8xf32> to vector<8x1xf32>
    %21 = arith.maximumf %15, %20 : vector<8x1xf32>
    %22 = arith.subf %15, %21 : vector<8x1xf32>
    %23 = math.exp %22 : vector<8x1xf32>
    %24 = vector.broadcast %21 : vector<8x1xf32> to vector<8x8xf32>
    %25 = arith.subf %18, %24 : vector<8x8xf32>
    %26 = math.exp %25 : vector<8x8xf32>
    %27 = arith.mulf %23, %16 : vector<8x1xf32>
    %cst_14 = arith.constant dense<0.000000e+00> : vector<8xf32>
    %28 = vector.multi_reduction <add>, %26, %cst_14 [1] : vector<8x8xf32> to vector<8xf32>
    %29 = vector.shape_cast %28 : vector<8xf32> to vector<8x1xf32>
    %30 = arith.addf %27, %29 : vector<8x1xf32>
    %31 = vector.broadcast %23 : vector<8x1xf32> to vector<8x8xf32>
    %32 = arith.mulf %31, %17 : vector<8x8xf32>
    %cst_15 = arith.constant dense<0.000000e+00> : vector<8x8xf32>
    %33 = tpu.matmul %26, %14, %cst_15 {dimension_numbers = #tpu.dot_dimension_numbers<[1], [0], [0], [1], [0, 0, 1, 1], [], []>} : vector<8x8xf32>, vector<8x8xf32>, vector<8x8xf32> -> vector<8x8xf32>
    %34 = arith.addf %32, %33 : vector<8x8xf32>
    %35 = tpu.reciprocal %30 : vector<8x1xf32> -> vector<8x1xf32>
    %36 = vector.broadcast %35 : vector<8x1xf32> to vector<8x8xf32>
    %37 = arith.mulf %34, %36 : vector<8x8xf32>
    %c0_16 = arith.constant 0 : index
    %c0_17 = arith.constant 0 : index
    %38 = vector.load %arg8[%c0_16, %c0_17] : memref<8x32xf32, #tpu.memory_space<vmem>>, vector<8x32xf32>
    %c0_18 = arith.constant 0 : index
    %c0_19 = arith.constant 0 : index
    %c0_20 = arith.constant 0 : index
    %39 = vector.load %arg5[%c0_18, %c0_19, %c0_20] : memref<1x8x32xf32, #tpu.memory_space<vmem>>, vector<1x8x32xf32>
    %40 = vector.shape_cast %39 : vector<1x8x32xf32> to vector<8x32xf32>
    %cst_21 = arith.constant dense<0.000000e+00> : vector<8x32xf32>
    %41 = tpu.matmul %37, %40, %cst_21 {dimension_numbers = #tpu.dot_dimension_numbers<[1], [0], [0], [1], [0, 0, 1, 1], [], []>} : vector<8x8xf32>, vector<8x32xf32>, vector<8x32xf32> -> vector<8x32xf32>
    %42 = arith.addf %38, %41 : vector<8x32xf32>
    %c0_22 = arith.constant 0 : index
    %c0_23 = arith.constant 0 : index
    %43 = vector.load %arg8[%c0_22, %c0_23] : memref<8x32xf32, #tpu.memory_space<vmem>>, vector<8x32xf32>
    tpu.vector_store %arg8[%c0_22, %c0_23], %42 {strides = array<i32>} : memref<8x32xf32, #tpu.memory_space<vmem>>, vector<8x32xf32>,
    %c3_i32 = arith.constant 3 : i32
    %44 = arith.cmpi eq, %arg1, %c3_i32 : i32
    %45 = arith.extui %44 : i1 to i32
    %c0_i32_24 = arith.constant 0 : i32
    %46 = arith.cmpi ne, %45, %c0_i32_24 : i32
    scf.if %46 {
      %c0_25 = arith.constant 0 : index
      %c0_26 = arith.constant 0 : index
      %47 = vector.load %arg8[%c0_25, %c0_26] : memref<8x32xf32, #tpu.memory_space<vmem>>, vector<8x32xf32>
      %c0_27 = arith.constant 0 : index
      %c0_28 = arith.constant 0 : index
      %48 = vector.load %arg6[%c0_27, %c0_28] : memref<1x32xf32, #tpu.memory_space<vmem>>, vector<1x32xf32>
      %49 = vector.broadcast %48 : vector<1x32xf32> to vector<8x32xf32>
      %50 = arith.addf %47, %49 : vector<8x32xf32>
      %c0_29 = arith.constant 0 : index
      %c0_30 = arith.constant 0 : index
      %c0_31 = arith.constant 0 : index
      %51 = vector.load %arg7[%c0_29, %c0_30, %c0_31] : memref<1x8x32xf32, #tpu.memory_space<vmem>>, vector<1x8x32xf32>
      %52 = vector.shape_cast %51 : vector<1x8x32xf32> to vector<8x32xf32>
      %53 = vector.shape_cast %50 : vector<8x32xf32> to vector<1x8x32xf32>
      tpu.vector_store %arg7[%c0_29, %c0_30, %c0_31], %53 {strides = array<i32>} : memref<1x8x32xf32, #tpu.memory_space<vmem>>, vector<1x8x32xf32>,
    } else {
    }
    return
  }
  func.func @transform_0(%arg0: i32, %arg1: i32) -> (i32, i32, i32) {
    %c0_i32 = arith.constant 0 : i32
    %c0_i32_0 = arith.constant 0 : i32
    %c0_i32_1 = arith.constant 0 : i32
    return %arg0, %c0_i32, %c0_i32_0 : i32, i32, i32
  }
  func.func @transform_1(%arg0: i32, %arg1: i32) -> (i32, i32, i32) {
    %c0_i32 = arith.constant 0 : i32
    %c0_i32_0 = arith.constant 0 : i32
    %c0_i32_1 = arith.constant 0 : i32
    return %arg1, %c0_i32, %c0_i32_0 : i32, i32, i32
  }
  func.func @transform_2(%arg0: i32, %arg1: i32) -> (i32, i32, i32) {
    %c0_i32 = arith.constant 0 : i32
    %c0_i32_0 = arith.constant 0 : i32
    %c0_i32_1 = arith.constant 0 : i32
    return %arg1, %c0_i32, %c0_i32_0 : i32, i32, i32
  }
  func.func @transform_3(%arg0: i32, %arg1: i32) -> (i32, i32, i32) {
    %c0_i32 = arith.constant 0 : i32
    %c0_i32_0 = arith.constant 0 : i32
    %c0_i32_1 = arith.constant 0 : i32
    return %arg1, %c0_i32, %c0_i32_0 : i32, i32, i32
  }
  func.func @transform_4(%arg0: i32, %arg1: i32) -> (i32, i32) {
    %c0_i32 = arith.constant 0 : i32
    %c0_i32_0 = arith.constant 0 : i32
    %c0_i32_1 = arith.constant 0 : i32
    return %c0_i32, %c0_i32_0 : i32, i32
  }
  func.func @transform_5(%arg0: i32, %arg1: i32) -> (i32, i32, i32) {
    %c0_i32 = arith.constant 0 : i32
    %c0_i32_0 = arith.constant 0 : i32
    %c0_i32_1 = arith.constant 0 : i32
    return %arg0, %c0_i32, %c0_i32_0 : i32, i32, i32
  }
}

</mosaic_0001>

<bundles_post_ra>
// kernel: tpu_custom_call.1
= control target key start
LH: loop header
LB: loop body
LE: loop exit
PB: predicated region body
PF: predicated region fallthrough
CT: control target
= control target key end

     0   :  { %10 = vsyncpa [#allocation4], 0  ;;  %s1216_s0 = inlined_call_operand.vmem [shape: f32[2,8,32], index: 0, kind: input, shape index: {}]   ;;  %s1217_s1 = inlined_call_operand.vmem [shape: f32[4,32,24], index: 1, kind: input, shape index: {}]   ;;  %s1218_s2 = inlined_call_operand.vmem [shape: f32[4,1,24], index: 2, kind: input, shape index: {}]   ;;  %s1219_s3 = inlined_call_operand.vmem [shape: f32[4,8,32], index: 3, kind: input, shape index: {}]   ;;  %s1220_s4 = inlined_call_operand.vmem [shape: f32[1,32], index: 4, kind: input, shape index: {}]   ;;  %s1221_s5 = inlined_call_operand.hbm [shape: f32[2,8,32], index: 5, kind: output, shape index: {}]  }
   0x1   :  { %12 = vsyncpa [#allocation4 + $0x1], 0  ;;  %s1037_s18 = smov 0   ;;  %s1039_s19 = smov 0  }
   0x2   :  { %s1041_s20 = smov 0   ;;  %s1043_s21 = smov 0  }
   0x3   :  { %s1045_s22 = smov 0   ;;  %s1047_s23 = smov 0  }
   0x4   :  { %s1049_s24 = smov 0   ;;  %s1051_s25 = smov 0  }
   0x5 LB: > { %1227 = sst [smem:[#allocation6_spill]] %s978_s20  ;;  %s754_s26 = sadd.s32 4294967295, %s998_s25   ;;  %s998_s25 = sphi %s1051_s25, %s18_s25   ;;  %s994_s24 = sphi %s1049_s24, %s1241_s24   ;;  %s990_s23 = sphi %s1047_s23, %s1240_s23   ;;  %s986_s22 = sphi %s1045_s22, %s1239_s22   ;;  %s982_s21 = sphi %s1043_s21, %s1238_s21   ;;  %s978_s20 = sphi %s1041_s20, %s1237_s20   ;;  %s974_s19 = sphi %s1039_s19, %s1243_s19   ;;  %s970_s18 = sphi %s1037_s18, %s1242_s18  }
   0x6   : > { %1228 = sst [smem:[#allocation7_spill]] %s990_s23  ;;  %s755_s27 = sadd.s32 4294967294, %s998_s25  }
   0x7   : > { %1229 = sst [smem:[#allocation8_spill]] %s994_s24  ;;  %s27_s28 = sadd.s32 1, %s990_s23 }
   0x8   : > { %p28_p0 = scmp.ge.s32.totalorder %s27_s28, 4  ;;  %s30_s29 = sadd.s32 1, %s994_s24 }
   0x9   : > { %p172_p1 = scmp.ne.s32.totalorder %s978_s20, %s974_s19  ;;  %p173_p2 = scmp.eq.s32.totalorder %s754_s26, 7 }
   0xa   : > { %s1245_s28 = smov (%p28_p0, %s27_s28), 0  ;;  %s1247_s29 = smov (!%p28_p0, %s30_s29), %s994_s24 }
   0xb   : > { %1230 = sst [smem:[#allocation9_spill]] %s1245_s28  ;;  %p1086_p3 = por %p173_p2, %p172_p1 }
   0xc   : > { %p178_p4 = scmp.ne.s32.totalorder %s974_s19, %s970_s18  ;;  %p32_p5 = scmp.ge.s32.totalorder %s1247_s29, 2 }
   0xd   : > { %p179_p6 = scmp.eq.s32.totalorder %s755_s27, 7  ;;  %p758_p7 = scmp.ge.s32.totalorder %s998_s25, 1 }
   0xe   : > { %p228_p8 = scmp.lt.s32.totalorder %s998_s25, 9  ;;  %s1249_s29 = smov (%p32_p5, %s1247_s29), 0 }
   0xf   : > { %1232 = sst [smem:[#allocation10_spill]] %s1249_s29  ;;  %p1096_p9 = por %p179_p6, %p178_p4 }
  0x10   : > { %p229_p10 = pnand %p758_p7, %p228_p8  ;;  %s159_s7 = ssub.s32 %s994_s24, %s1249_s29 }
  0x11   : > { %s162_s8 = sadd.s32 1, %s978_s20  ;;  %p160_p11 = scmp.eq.s32.totalorder %s159_s7, 0 }
  0x12   : > { %232 = sbr.rel (%p229_p10) target bundleno = 1215 (0x4bf), region = 40  ;;  %s1222_s10 = sand.u32 (!%p229_p10), 1, %s974_s19  }
  0x13   : > { %s1104_s9 = scalar_select %p160_p11, %s978_s20, %s162_s8  }
  0x14   : > { %p267_p12 = scmp.lt.s32.totalorder (!%p229_p10), %s986_s22, 1  ;;  %s1110_s11 = sshll.u32 (!%p229_p10), %s1222_s10, 3 }
  0x15   : > { %1234 = sst [smem:[#allocation11_spill]] %s1104_s9  ;;  %p271_p13 = scmp.lt.s32.totalorder (!%p229_p10), %s982_s21, 3 }
  0x16   : > { %p764_p0 = scmp.ne.s32.totalorder (!%p229_p10), %s982_s21, 0 }
  0x19   : > { %s268_s12 = scalar_select %p267_p12, %s986_s22, 1 }
  0x1a   : > { %s1115_s13 = scalar_select %p271_p13, %s982_s21, 3 }
  0x1b   : > { %s760_s14 = sshll.u32 %s268_s12, 3  ;;  %s266_s12 = scalar_lea.vmem [#allocation3], %s1110_s11  ;;  %vm287_vm0 = vcmask (!%p764_p0), 261120   ;;  %v1000_v0 = vmov (!%p764_p0), 0.0  }
  0x1c   : > { %s270_s17 = scalar_lea.vmem %s1216_s0, %s760_s14  ;;  %s777_s26 = sshll.u32 %s1115_s13, 5  ;;  %288 = vst.msk [vmem:[#allocation2] sm:$0xff] (!%p764_p0), %vm287_vm0, %v1000_v0 }
  0x1d   : > { %s275_s8 = scalar_lea.vmem %s1217_s1, %s777_s26  ;;  %s278_s28 = scalar_lea.vmem %s1218_s2, %s1115_s13 }
  0x1e   : > { %s763_s24 = sshll.u32 %s1115_s13, 3  ;;  %286 = sbr.rel (%p764_p0) target bundleno = 37 (0x25), region = 44 }
  0x1f   : > { %s1132_s20 = scalar_lea.vmem %s1219_s3, %s763_s24 }
  0x25 PF: > { %v290_v1 = vld [vmem:[%s275_s8] sm:$0xff]  ;;  %v291_v2 = vld [vmem:[%s275_s8 + $0x8] sm:$0xff]  ;;  %v292_v3 = vld [vmem:[%s275_s8 + $0x10] sm:$0xff]  ;;  %v1001_v4 = vmov 0.0|0.0   ;;  %vm1002_vm1 = vmmov 0   ;;  %v1003_v7 = vmov 0.0  }
  0x26   : > { %815 = vmatprep.subr.bf16.mxu0 %v1001_v4  ;;  %v816_v5 = vpack.c.bf16 %v291_v2, %v290_v1  ;;  %v293_v6 = vld [vmem:[%s275_s8 + $0x18] sm:$0xff]  ;;  %797 = vmatprep.mubr.msk.f32.mxu0 %vm1002_vm1, %v1003_v7  ;;  %v289_v9 = vld [vmem:[%s270_s17] sm:$0xff]  ;;  %vm301_vm2 = vcmask 261120   ;;  %s1004_s29 = smov 112   ;;  %s1005_s9 = smov 120   ;;  %vm378_vm3 = vcmask 64512  }
  0x27   : > { %800 = vmatprep.subr.mxu1 %v1003_v7  ;;  %802 = vmatprep.mubr.msk.f32.mxu1 %vm1002_vm1, %v1003_v7  ;;  %v819_v8 = vpack.c.bf16 %v293_v6, %v292_v3  ;;  %v765_v10 = vld [vmem:[%s278_s28] ss:$0 sm:$0xff]  ;;  %p771_p1 = scmp.ne.s32.totalorder %s982_s21, 3 }
  0x28   : > { %817 = vmatpush3.bf16.msra.mxu0 %v816_v5  ;;  %v547_v24 = vld [vmem:[%s1132_s20] sm:$0xff] }
  0x29   : > { %818 = vmatprep.subr.bf16.mxu0 %v1001_v4  ;;  %v546_v36 = vld [vmem:[#allocation2] sm:$0xff] }
  0x2a   : > { %v772_v41 = vld [vmem:[%s1220_s4] ss:$0 sm:$0xff] (!%p771_p1) }
  0x2c   : > { %820 = vmatpush3.bf16.msra.mxu0 %v819_v8 }
  0x2d   : > { %810 = vmatprep.subr.mxu0 %v1003_v7 }
  0x2f   : > { %798 = vmatmul.mubr.msk.f32.vlgmr.msra.gmra.mrb[0].mxu0 %vm301_vm2, %v289_v9 }
  0x30   : > { %812 = vmatprep.mubr.msk.f32.mxu0 %vm1002_vm1, %v1003_v7  ;;  %811 = vmatpush3.msra.mxu0 %v547_v24 }
 0x102   : > { %v371_v11 = vpop.f32.mrb[0].mxu0 }
 0x103   : > { %v372_v12 = vadd.f32 %v765_v10, %v371_v11  ;;  %v799_v13 = vpop.f32.mrb[1].mxu0 }
 0x105   : > { %467 = vrot.lane.b32.xlu1 %v372_v12, %s1004_s29  ;;  %376 = vrot.lane.b32.xlu0 %v372_v12, %s1005_s9 }
 0x177   : > { %v377_v14 = vpop.permute.xlu0 %376  ;;  %v468_v15 = vpop.permute.xlu1 %467 }
 0x178   : > { %801 = vmatpush3.xpose.msk.msra.mxu1 %vm378_vm3, %v377_v14 }
 0x179   : > { %805 = vmatprep.subr.mxu1 %v1003_v7 }
 0x17b   : > { %803 = vmatmul.mubr.msk.f32.vlgmr.msra.gmra.mrb[0].mxu1 %vm378_vm3, %v372_v12 }
 0x17c   : > { %806 = vmatpush3.msra.mxu1 %v468_v15  ;;  %807 = vmatprep.mubr.msk.f32.mxu1 %vm1002_vm1, %v1003_v7 }
 0x24e   : > { %v449_v16 = vpop.f32.mrb[0].mxu1 }
 0x24f   : > { %v804_v17 = vpop.f32.mrb[1].mxu1  ;;  %v453_v18 = vsel %vm378_vm3, %v449_v16, -inf }
 0x250   : > { %454 = vmax.xlane.f32.xlu0 %v453_v18 }
 0x2dd   : > { %v455_v19 = vpop.xlane.xlu0 %454 }
 0x2de   : > { %v459_v20 = vsub.f32 %v449_v16, %v455_v19  ;;  %v456_v25 = vsub.f32 -inf, %v455_v19 }
 0x2e0   : > { %v460_v21 = vmul.f32 1.442695, %v459_v20  ;;  %v457_v26 = vmul.f32 1.442695, %v456_v25 }
 0x2e2   : > { %898 = vpow2.f32 %v460_v21 }
 0x2e3   : > { %900 = vpow2.f32 %v457_v26 }
 0x2ec   : > { %v899_v22 = vpop.eup %898 }
 0x2ed   : > { %808 = vmatmul.mubr.msk.f32.vlgmr.msra.gmra.mrb[2].mxu1 %vm378_vm3, %v899_v22  ;;  %v463_v23 = vsel %vm378_vm3, %v899_v22, 0.0  ;;  %v901_v27 = vpop.eup %900 }
 0x2ee   : > { %464 = vadd.xlane.f32.xlu1 %v463_v23  ;;  %v462_v29 = vmul.f32 0.0, %v901_v27 }
 0x37b   : > { %v465_v28 = vpop.xlane.xlu1 %464 }
 0x37c   : > { %v466_v30 = vadd.f32 %v465_v28, %v462_v29 }
 0x37e   : > { %902 = vrcp.f32 %v466_v30 }
 0x388   : > { %v903_v34 = vpop.eup %902 }
 0x3c0   : > { %v539_v31 = vpop.f32.mrb[2].mxu1 }
 0x3c1   : > { %v543_v32 = vadd.f32 %v539_v31, %v462_v29  ;;  %v809_v33 = vpop.f32.mrb[3].mxu1 }
 0x3c3   : > { %v545_v35 = vmul.f32 %v903_v34, %v543_v32 }
 0x3c5   : > { %813 = vmatmul.mubr.msk.f32.vlgmr.msra.gmra.mrb[2].mxu0 %vm378_vm3, %v545_v35 }
 0x495   : > { %626 = sbr.rel (%p771_p1) target bundleno = 1190 (0x4a6), region = 48 }
 0x498   : > { %v617_v37 = vpop.f32.mrb[2].mxu0 }
 0x499   : > { %v621_v38 = vadd.f32 %v617_v37, %v546_v36  ;;  %v814_v39 = vpop.f32.mrb[3].mxu0 }
 0x49b   : > { %622 = vst.msk [vmem:[#allocation2] sm:$0xff] %vm301_vm2, %v621_v38 }
 0x4a2   : > { %v627_v40 = vld [vmem:[#allocation2] sm:$0xff] }
 0x4a3   : > { %v635_v42 = vadd.f32 %v772_v41, %v627_v40 }
 0x4a5   : > { %636 = vst.msk [vmem:[%s266_s12] sm:$0xff] %vm301_vm2, %v635_v42 }
 0x4a6 PF: > { %s774_s10 = sshll.u32 %s986_s22, 7  ;;  %s651_s15 = sshll.u32 %s266_s12, 4  ;;  %s652_s15 = int_to_ptr.vmem [resolvable:$true] %s651_s15 }
 0x4a7   : > { %s1165_s21 = scalar_lea.hbm %s1221_s5, %s774_s10  ;;  %s1235_s16 = sand.u32 1, %s974_s19  }
 0x4a8   : > { %s638_s17 = scalar_lea.sflag [#allocation4], %s1235_s16  ;;  %s904_s26 = scalar_lea.vmem %s652_s15, 128 }
 0x4a9   : > { %p905_p2 = scmp.ne.s32.totalorder %s652_s15, %s904_s26  ;;  %s1006_s27 = smov [#allocation3]  }
 0x4aa   : > { %s908_s7 = sshll.u32 %s1006_s27, 4  ;;  %s909_s7 = int_to_ptr.vmem [resolvable:$false] %s908_s7 }
 0x4ab   : > { %p906_p4 = pnand %p905_p2, %p1086_p3  ;;  %s910_s8 = scalar_lea.vmem %s909_s7, 256 }
 0x4ac   : > { %p911_p6 = scmp.lt.s32.totalorder %s652_s15, %s909_s7  ;;  %p912_p7 = scmp.lt.s32.totalorder %s910_s8, %s904_s26 }
 0x4ad   : > { %p907_p5 = pneg %p906_p4 }
 0x4ae   : > { %p913_p8 = por %p912_p7, %p911_p6 }
 0x4b0   : > { %p914_p10 = pnand %p913_p8, %p907_p5 }
 0x4b2   : > { %917 = shalt.err (!%p914_p10)
}
 0x4b3   : > { %s918_s22 = scalar_lea.hbm %s1165_s21, 128  ;;  %s922_s23 = scalar_lea.hbm %s1221_s5, 256 }
 0x4b4   : > { %p919_p11 = scmp.ne.s32.totalorder %s1165_s21, %s918_s22  ;;  %p923_p0 = scmp.lt.u32.totalorder %s1165_s21, %s1221_s5 }
 0x4b5   : > { %p924_p1 = scmp.lt.u32.totalorder %s922_s23, %s918_s22  ;;  %p926_p4 = scmp.lt.u32.totalorder %s918_s22, %s1165_s21 }
 0x4b6   : > { %p920_p12 = pnand %p919_p11, %p1086_p3 }
 0x4b7   : > { %p925_p2 = por %p924_p1, %p923_p0 }
 0x4b8   : > { %p921_p13 = pneg %p920_p12 }
 0x4b9   : > { %p927_p5 = por %p926_p4, %p925_p2 }
 0x4bb   : > { %p928_p6 = pnand %p927_p5, %p921_p13 }
 0x4bd   : > { %931 = shalt.err (!%p928_p6)
}
 0x4be   : > { %821 = dma.vmem_to_hbm [thread:$0]  (%p1086_p3), %s652_s15, 128, %s1165_s21, %s638_s17  }
 0x4bf PF: > { %p827_p7 = scmp.ge.s32.totalorder %s998_s25, 2  ;;  %s663_s9 = sand.u32 1, %s970_s18  }
 0x4c0   : > { %s664_s20 = scalar_lea.sflag [#allocation4], %s663_s9 }
 0x4c1   : > { %p824_p8 = pnand %p827_p7, %p1096_p9 }
 0x4c3   : > { %965 = dma.done.wait (!%p824_p8), %s664_s20, 128  }
 0x4c4   : > { %967 = vsyncadd (!%p824_p8), %s664_s20, 4294967168  ;;  %s18_s25 = sadd.s32 1, %s998_s25   ;;  %s1236_s28 = sld [smem:[#allocation6_spill]] }
 0x4c5   : > { %p15_p10 = scmp.ge.s32.totalorder %s18_s25, 10   ;;  %s1237_s20 = sld [smem:[#allocation11_spill]] }
 0x4c6   : > { %s1238_s21 = sld [smem:[#allocation7_spill]]  ;;  %s1239_s22 = sld [smem:[#allocation8_spill]] }
 0x4c7   : > { %s1240_s23 = sld [smem:[#allocation9_spill]]  ;;  %s1241_s24 = sld [smem:[#allocation10_spill]] }
 0x4c8   : > { %s1242_s18 = smov %s974_s19  ;;  %17 = sbr.rel (!%p15_p10) target bundleno = 5 (0x5), region = 92 }
 0x4ca   : > { %s1243_s19 = smov %s1236_s28 }
 0x4cf   :  { %669 = vsyncpa [#allocation4], 1 }
 0x4d0   :  { %671 = vsyncpa [#allocation4 + $0x1], 1 }

</bundles_post_ra>
